<compile_context>
chip_gen: v6e
topology: v6e:2x2x1
jax: 0.10.0
libtpu: 0.0.40
codegen_flags: <defaults>
</compile_context>

<pallas_src>
import jax
import jax.numpy as jnp
from jax.experimental import pallas as pl
from jax.experimental.pallas import tpu as pltpu

F_BASELINE = 0.8  # synthetic stand-in for the rescale_with_baseline F1 baseline


def _bertscore_kernel(hyp_ref, ref_ref, hlen_ref, rlen_ref, o_ref):
    # Block shapes:
    #   hyp  (bt, thp, dp)  bf16     ref  (bt, trp, dp) bf16
    #   hlen (bt, 1, 128)   int32    rlen (bt, 1, 128)  int32 (length replicated)
    #   o    (bt, 1, 128)   f32
    bt, thp, _ = hyp_ref.shape
    trp = ref_ref.shape[1]

    hyp = hyp_ref[...]
    ref = ref_ref[...]

    # Reference side: L2-normalize before the matmul (lane-reduce keepdims +
    # broadcast multiply are layout-trivial; result goes straight to the MXU
    # as a bf16 operand).  Elementwise math stays in f32 (v5e has no bf16 VPU).
    ref32 = ref.astype(jnp.float32)
    ref_n = (ref32 * jax.lax.rsqrt(
        jnp.sum(ref32 * ref32, axis=2, keepdims=True) + 1e-12)).astype(ref.dtype)

    # Raw inner products on the MXU, NT form (contraction on the minor dim of
    # both operands), f32 accumulation:  (bt,thp,dp) x (bt,trp,dp) -> (bt,thp,trp)
    s = jnp.einsum("bhd,brd->bhr", hyp, ref_n,
                   preferred_element_type=jnp.float32)

    # Hypothesis side: fold the normalization past the matmul — a single
    # (bt,thp,1) broadcast multiply on the f32 sim tile we already touch.
    hyp32 = hyp.astype(jnp.float32)
    inv_h = jax.lax.rsqrt(jnp.sum(hyp32 * hyp32, axis=2, keepdims=True) + 1e-12)
    sim = s * inv_h                                        # (bt, thp, trp) f32

    # Rebuild the validity masks from per-pair lengths (trailing padding) with
    # broadcasted_iota; additive -1e9 bias applied AFTER the inv-norm scaling
    # so padded rows/cols always lose the max.
    hlen = jnp.max(hlen_ref[...], axis=2, keepdims=True)   # (bt, 1, 1) int32
    rlen = jnp.max(rlen_ref[...], axis=2, keepdims=True)   # (bt, 1, 1) int32
    h_pos = jax.lax.broadcasted_iota(jnp.int32, (bt, thp, 1), 1)
    r_pos = jax.lax.broadcasted_iota(jnp.int32, (bt, 1, trp), 2)
    hvalid = (h_pos < hlen).astype(jnp.float32)            # (bt, thp, 1)
    rvalid = (r_pos < rlen).astype(jnp.float32)            # (bt, 1, trp)
    sim_m = sim + (hvalid - 1.0) * 1e9 + (rvalid - 1.0) * 1e9

    # Greedy matching.
    p_tok = jnp.max(sim_m, axis=2, keepdims=True)          # (bt, thp, 1)
    r_tok = jnp.max(sim_m, axis=1, keepdims=True)          # (bt, 1, trp)

    # Token counts come straight from the lengths (clamped for empty pairs).
    h_cnt = jnp.maximum(hlen.astype(jnp.float32), 1.0)     # (bt, 1, 1)
    r_cnt = jnp.maximum(rlen.astype(jnp.float32), 1.0)     # (bt, 1, 1)

    p = jnp.sum(p_tok * hvalid, axis=1, keepdims=True) / h_cnt   # (bt, 1, 1)
    r = jnp.sum(r_tok * rvalid, axis=2, keepdims=True) / r_cnt   # (bt, 1, 1)

    # F1 with a zero-denominator guard (bert-score fills NaN with 0); avoids
    # the sign-flip a plain max(P+R, eps) clamp would cause for negative P+R.
    denom = p + r
    bad = jnp.abs(denom) < 1e-8
    f = jnp.where(bad, 0.0, 2.0 * p * r / jnp.where(bad, 1.0, denom))

    # rescale_with_baseline=True (multiply by the constant reciprocal).
    f_rescaled = (f - F_BASELINE) * (1.0 / (1.0 - F_BASELINE))

    # Lane-dense writeback: replicate the per-pair score across all 128 lanes
    # so the store is a full unmasked vst; the wrapper reads lane 0.
    o_ref[...] = jnp.broadcast_to(f_rescaled, o_ref.shape).astype(o_ref.dtype)


def _round_up(x, m):
    return ((x + m - 1) // m) * m


def _pad_to(x, axis, target):
    pad = target - x.shape[axis]
    if pad == 0:
        return x
    widths = [(0, 0)] * x.ndim
    widths[axis] = (0, pad)
    return jnp.pad(x, widths)


def _workset_bytes(bt, thp, trp, dp):
    """Conservative per-grid-step VMEM working-set estimate (bytes)."""
    hyp_b = bt * thp * dp * 2            # bf16 hyp tile
    ref_b = bt * trp * dp * 2            # bf16 ref tile
    lens_b = 2 * bt * 1 * 128 * 4        # int32 length tiles
    out_b = bt * 1 * 128 * 4             # f32 output tile
    pipelined = 2 * (hyp_b + ref_b + lens_b + out_b)       # double-buffered DMA windows
    f32_tmp = bt * trp * dp * 4 + bt * trp * dp * 2        # ref f32 upcast + normalized bf16 copy
    f32_tmp += bt * thp * dp * 4                           # hyp f32 upcast for sum-of-squares
    sim_b = 3 * bt * thp * trp * 4                         # s / sim / sim_m f32 tiles
    return pipelined + f32_tmp + sim_b


def bert_score_f(hyp_emb, ref_emb, hyp_mask, ref_mask,
                 block_b=16, vmem_budget_mib=48):
    """Compute BERTScore F1 per (hyp, ref) pair.

    hyp_emb:  [B, Th, D]  hypothesis token embeddings (bf16 or f32)
    ref_emb:  [B, Tr, D]  reference token embeddings
    hyp_mask: [B, Th]     1.0 for real tokens, 0.0 for (trailing) padding
    ref_mask: [B, Tr]
    returns:  [B] f32 baseline-rescaled F1 scores

    vmem_budget_mib defaults to 48 MiB (safe on v7x's 64 MiB/TensorCore);
    raise to ~96 on v5e/v6e (128 MiB VMEM) to allow larger batch tiles.
    """
    B, Th, D = hyp_emb.shape
    _, Tr, _ = ref_emb.shape

    # Lane/sublane-native padding targets (layout plumbing, fused by XLA):
    thp = _round_up(Th, 16)     # bf16 sublane packing / MXU M dim
    trp = _round_up(Tr, 128)    # lane dim of sim and the MXU N dim
    dp = _round_up(D, 128)      # contraction dim / operand lane dim

    # Batch tile: largest tile that fits the VMEM budget.  For B > block_b the
    # tile is sublane-aligned (multiple of 8) so the lane-dense output block
    # stays legal; with nb >= 2 the "parallel" batch axis spans both v7x TCs.
    budget = vmem_budget_mib << 20
    if B <= block_b and _workset_bytes(B, thp, trp, dp) <= budget:
        bt = B
    else:
        bt = max(8, (min(block_b, max(B, 8)) // 8) * 8)
        while bt > 8 and _workset_bytes(bt, thp, trp, dp) > budget:
            bt -= 8
    nb = -(-B // bt)
    bp = nb * bt

    # Per-pair lengths from the attention masks (tokenizer masks are
    # trailing-padded, so a length + iota comparison reproduces them exactly).
    hyp_len = jnp.sum(hyp_mask.astype(jnp.int32), axis=1)   # (B,)
    ref_len = jnp.sum(ref_mask.astype(jnp.int32), axis=1)

    # Pad hidden, token and batch dims (padding is neutralized in-kernel by
    # the length-derived additive bias; zero hidden padding is norm-neutral).
    hyp_emb = _pad_to(_pad_to(_pad_to(hyp_emb, 2, dp), 1, thp), 0, bp)
    ref_emb = _pad_to(_pad_to(_pad_to(ref_emb, 2, dp), 1, trp), 0, bp)

    # Lengths as tiny lane-dense (bp, 1, 128) int32 tiles (value replicated
    # across lanes) -> full-lane vld, no lane-width-1 mask blocks, and the two
    # big mask DMAs of the previous version disappear.
    hlen3 = jnp.broadcast_to(_pad_to(hyp_len, 0, bp)[:, None, None], (bp, 1, 128))
    rlen3 = jnp.broadcast_to(_pad_to(ref_len, 0, bp)[:, None, None], (bp, 1, 128))

    vmem_limit = int(min(100 << 20,
                         max(32 << 20, 1.3 * _workset_bytes(bt, thp, trp, dp))))

    out = pl.pallas_call(
        _bertscore_kernel,
        out_shape=jax.ShapeDtypeStruct((bp, 1, 128), jnp.float32),
        grid_spec=pltpu.PrefetchScalarGridSpec(
            num_scalar_prefetch=0,
            grid=(nb,),
            in_specs=[
                pl.BlockSpec((bt, thp, dp), lambda b: (b, 0, 0)),
                pl.BlockSpec((bt, trp, dp), lambda b: (b, 0, 0)),
                pl.BlockSpec((bt, 1, 128), lambda b: (b, 0, 0)),
                pl.BlockSpec((bt, 1, 128), lambda b: (b, 0, 0)),
            ],
            out_specs=pl.BlockSpec((bt, 1, 128), lambda b: (b, 0, 0)),
        ),
        compiler_params=pltpu.CompilerParams(
            # Pairs are fully independent -> batch axis shards across the two
            # TensorCores on v7x when nb >= 2; neutral on v5e/v6e.
            dimension_semantics=("parallel",),
            vmem_limit_bytes=vmem_limit,
        ),
    )(hyp_emb, ref_emb, hlen3, rlen3)

    return out[:B, 0, 0]


def _reference_bert_score_f(hyp_emb, ref_emb, hyp_mask, ref_mask):
    """Plain-JAX reference mirroring the kernel's numerical path."""
    r32 = ref_emb.astype(jnp.float32)
    rn = (r32 * jax.lax.rsqrt(jnp.sum(r32 * r32, -1, keepdims=True) + 1e-12)
          ).astype(ref_emb.dtype)
    s = jnp.einsum("bhd,brd->bhr", hyp_emb, rn, preferred_element_type=jnp.float32)
    h32 = hyp_emb.astype(jnp.float32)
    inv_h = jax.lax.rsqrt(jnp.sum(h32 * h32, -1, keepdims=True) + 1e-12)
    sim = s * inv_h
    hm = hyp_mask.astype(jnp.float32)
    rm = ref_mask.astype(jnp.float32)
    sim_m = sim + (hm[:, :, None] - 1.0) * 1e9 + (rm[:, None, :] - 1.0) * 1e9
    p = jnp.sum(jnp.max(sim_m, 2) * hm, 1) / jnp.maximum(jnp.sum(hm, 1), 1.0)
    r = jnp.sum(jnp.max(sim_m, 1) * rm, 1) / jnp.maximum(jnp.sum(rm, 1), 1.0)
    denom = p + r
    bad = jnp.abs(denom) < 1e-8
    f = jnp.where(bad, 0.0, 2.0 * p * r / jnp.where(bad, 1.0, denom))
    return (f - F_BASELINE) * (1.0 / (1.0 - F_BASELINE))


if __name__ == "__main__":
    key = jax.random.PRNGKey(0)
    B, Th, Tr, D = 2, 8, 8, 32  # batch of 2 sentence pairs, seq=8, hidden=32

    k1, k2 = jax.random.split(key)
    # Deterministic synthetic "DistilBERT layer-4" token embeddings, kept in
    # bf16 through the DMA path (MXU takes bf16 operands, accumulates in f32).
    hyp_emb = jax.random.normal(k1, (B, Th, D), dtype=jnp.float32).astype(jnp.bfloat16)
    ref_emb = jax.random.normal(k2, (B, Tr, D), dtype=jnp.float32).astype(jnp.bfloat16)

    # Attention masks: pair 0 uses all tokens, pair 1 has trailing padding.
    hyp_mask = jnp.array(
        [[1, 1, 1, 1, 1, 1, 1, 1],
         [1, 1, 1, 1, 1, 0, 0, 0]], dtype=jnp.float32)
    ref_mask = jnp.array(
        [[1, 1, 1, 1, 1, 1, 1, 1],
         [1, 1, 1, 1, 1, 1, 0, 0]], dtype=jnp.float32)

    score_fn = jax.jit(bert_score_f)
    f_scores = jax.block_until_ready(score_fn(hyp_emb, ref_emb, hyp_mask, ref_mask))

    f_ref = _reference_bert_score_f(hyp_emb, ref_emb, hyp_mask, ref_mask)
    assert jnp.allclose(f_scores, f_ref, atol=2e-3, rtol=2e-3), (f_scores, f_ref)

    print("KERNEL_OK")
</pallas_src>

<mosaic_0001>
module attributes {stable_mosaic.version = 11 : i64} {
  func.func @_bertscore_kernel(%arg0: i32, %arg1: memref<2x16x128xbf16, #tpu.memory_space<vmem>>, %arg2: memref<2x128x128xbf16, #tpu.memory_space<vmem>>, %arg3: memref<2x1x128xi32, #tpu.memory_space<vmem>>, %arg4: memref<2x1x128xi32, #tpu.memory_space<vmem>>, %arg5: memref<2x1x128xf32, #tpu.memory_space<vmem>>) attributes {dimension_semantics = [#tpu.dimension_semantics<parallel>], iteration_bounds = array<i64: 1>, scalar_prefetch = 0 : i64, scratch_operands = 0 : i64, tpu.core_type = #tpu.core_type<tc>, window_params = [{transform_indices = @transform_0, window_bounds = array<i64: 2, 16, 128>}, {transform_indices = @transform_1, window_bounds = array<i64: 2, 128, 128>}, {transform_indices = @transform_2, window_bounds = array<i64: 2, 1, 128>}, {transform_indices = @transform_3, window_bounds = array<i64: 2, 1, 128>}, {transform_indices = @transform_4, window_bounds = array<i64: 2, 1, 128>}]} {
    %c0 = arith.constant 0 : index
    %c0_0 = arith.constant 0 : index
    %c0_1 = arith.constant 0 : index
    %0 = vector.load %arg1[%c0, %c0_0, %c0_1] : memref<2x16x128xbf16, #tpu.memory_space<vmem>>, vector<2x16x128xbf16>
    %c0_2 = arith.constant 0 : index
    %c0_3 = arith.constant 0 : index
    %c0_4 = arith.constant 0 : index
    %1 = vector.load %arg2[%c0_2, %c0_3, %c0_4] : memref<2x128x128xbf16, #tpu.memory_space<vmem>>, vector<2x128x128xbf16>
    %2 = arith.extf %1 : vector<2x128x128xbf16> to vector<2x128x128xf32>
    %3 = arith.mulf %2, %2 : vector<2x128x128xf32>
    %cst = arith.constant dense<0.000000e+00> : vector<2x128xf32>
    %4 = vector.multi_reduction <add>, %3, %cst [2] : vector<2x128x128xf32> to vector<2x128xf32>
    %5 = vector.shape_cast %4 : vector<2x128xf32> to vector<2x128x1xf32>
    %cst_5 = arith.constant 9.99999996E-13 : f32
    %6 = vector.broadcast %cst_5 : f32 to vector<2x128x1xf32>
    %7 = arith.addf %5, %6 : vector<2x128x1xf32>
    %8 = math.rsqrt %7 : vector<2x128x1xf32>
    %9 = vector.broadcast %8 : vector<2x128x1xf32> to vector<2x128x128xf32>
    %10 = arith.mulf %2, %9 : vector<2x128x128xf32>
    %11 = arith.truncf %10 : vector<2x128x128xf32> to vector<2x128x128xbf16>
    "tpu.trace_start"() <{level = 10 : i32, message = "bhd,brd->bhr"}> : () -> ()
    %cst_6 = arith.constant dense<0.000000e+00> : vector<2x16x128xf32>
    %12 = tpu.matmul %0, %11, %cst_6 {dimension_numbers = #tpu.dot_dimension_numbers<[2], [2], [1], [1], [0, 0, 0, 1, 1, 1], [0], [0]>} : vector<2x16x128xbf16>, vector<2x128x128xbf16>, vector<2x16x128xf32> -> vector<2x16x128xf32>
    "tpu.trace_stop"() : () -> ()
    %13 = arith.extf %0 : vector<2x16x128xbf16> to vector<2x16x128xf32>
    %14 = arith.mulf %13, %13 : vector<2x16x128xf32>
    %cst_7 = arith.constant dense<0.000000e+00> : vector<2x16xf32>
    %15 = vector.multi_reduction <add>, %14, %cst_7 [2] : vector<2x16x128xf32> to vector<2x16xf32>
    %16 = vector.shape_cast %15 : vector<2x16xf32> to vector<2x16x1xf32>
    %cst_8 = arith.constant 9.99999996E-13 : f32
    %17 = vector.broadcast %cst_8 : f32 to vector<2x16x1xf32>
    %18 = arith.addf %16, %17 : vector<2x16x1xf32>
    %19 = math.rsqrt %18 : vector<2x16x1xf32>
    %20 = vector.broadcast %19 : vector<2x16x1xf32> to vector<2x16x128xf32>
    %21 = arith.mulf %12, %20 : vector<2x16x128xf32>
    %c0_9 = arith.constant 0 : index
    %c0_10 = arith.constant 0 : index
    %c0_11 = arith.constant 0 : index
    %22 = vector.load %arg3[%c0_9, %c0_10, %c0_11] : memref<2x1x128xi32, #tpu.memory_space<vmem>>, vector<2x1x128xi32>
    %cst_12 = arith.constant dense<-2147483648> : vector<2x1xi32>
    %23 = vector.multi_reduction <maxsi>, %22, %cst_12 [2] : vector<2x1x128xi32> to vector<2x1xi32>
    %24 = vector.shape_cast %23 : vector<2x1xi32> to vector<2x1x1xi32>
    %c0_13 = arith.constant 0 : index
    %c0_14 = arith.constant 0 : index
    %c0_15 = arith.constant 0 : index
    %25 = vector.load %arg4[%c0_13, %c0_14, %c0_15] : memref<2x1x128xi32, #tpu.memory_space<vmem>>, vector<2x1x128xi32>
    %cst_16 = arith.constant dense<-2147483648> : vector<2x1xi32>
    %26 = vector.multi_reduction <maxsi>, %25, %cst_16 [2] : vector<2x1x128xi32> to vector<2x1xi32>
    %27 = vector.shape_cast %26 : vector<2x1xi32> to vector<2x1x1xi32>
    %28 = tpu.iota {dimensions = array<i32: 1>} : vector<2x16x1xi32>
    %29 = tpu.iota {dimensions = array<i32: 2>} : vector<2x1x128xi32>
    %30 = vector.broadcast %24 : vector<2x1x1xi32> to vector<2x16x1xi32>
    %31 = arith.cmpi slt, %28, %30 : vector<2x16x1xi32>
    %32 = arith.extui %31 : vector<2x16x1xi1> to vector<2x16x1xi32>
    %33 = arith.sitofp %32 : vector<2x16x1xi32> to vector<2x16x1xf32>
    %34 = vector.broadcast %27 : vector<2x1x1xi32> to vector<2x1x128xi32>
    %35 = arith.cmpi slt, %29, %34 : vector<2x1x128xi32>
    %36 = arith.extui %35 : vector<2x1x128xi1> to vector<2x1x128xi32>
    %37 = arith.sitofp %36 : vector<2x1x128xi32> to vector<2x1x128xf32>
    %cst_17 = arith.constant 1.000000e+00 : f32
    %38 = vector.broadcast %cst_17 : f32 to vector<2x16x1xf32>
    %39 = arith.subf %33, %38 : vector<2x16x1xf32>
    %cst_18 = arith.constant 1.000000e+09 : f32
    %40 = vector.broadcast %cst_18 : f32 to vector<2x16x1xf32>
    %41 = arith.mulf %39, %40 : vector<2x16x1xf32>
    %42 = vector.broadcast %41 : vector<2x16x1xf32> to vector<2x16x128xf32>
    %43 = arith.addf %21, %42 : vector<2x16x128xf32>
    %cst_19 = arith.constant 1.000000e+00 : f32
    %44 = vector.broadcast %cst_19 : f32 to vector<2x1x128xf32>
    %45 = arith.subf %37, %44 : vector<2x1x128xf32>
    %cst_20 = arith.constant 1.000000e+09 : f32
    %46 = vector.broadcast %cst_20 : f32 to vector<2x1x128xf32>
    %47 = arith.mulf %45, %46 : vector<2x1x128xf32>
    %48 = vector.broadcast %47 : vector<2x1x128xf32> to vector<2x16x128xf32>
    %49 = arith.addf %43, %48 : vector<2x16x128xf32>
    %cst_21 = arith.constant dense<0xFF800000> : vector<2x16xf32>
    %50 = vector.multi_reduction <maximumf>, %49, %cst_21 [2] : vector<2x16x128xf32> to vector<2x16xf32>
    %51 = vector.shape_cast %50 : vector<2x16xf32> to vector<2x16x1xf32>
    %cst_22 = arith.constant dense<0xFF800000> : vector<2x128xf32>
    %52 = vector.multi_reduction <maximumf>, %49, %cst_22 [1] : vector<2x16x128xf32> to vector<2x128xf32>
    %53 = vector.shape_cast %52 : vector<2x128xf32> to vector<2x1x128xf32>
    %54 = arith.sitofp %24 : vector<2x1x1xi32> to vector<2x1x1xf32>
    %cst_23 = arith.constant 1.000000e+00 : f32
    %55 = vector.broadcast %cst_23 : f32 to vector<2x1x1xf32>
    %56 = arith.maximumf %54, %55 : vector<2x1x1xf32>
    %57 = arith.sitofp %27 : vector<2x1x1xi32> to vector<2x1x1xf32>
    %cst_24 = arith.constant 1.000000e+00 : f32
    %58 = vector.broadcast %cst_24 : f32 to vector<2x1x1xf32>
    %59 = arith.maximumf %57, %58 : vector<2x1x1xf32>
    %60 = arith.mulf %51, %33 : vector<2x16x1xf32>
    %cst_25 = arith.constant dense<0.000000e+00> : vector<2x1xf32>
    %61 = vector.multi_reduction <add>, %60, %cst_25 [1] : vector<2x16x1xf32> to vector<2x1xf32>
    %62 = vector.shape_cast %61 : vector<2x1xf32> to vector<2x1x1xf32>
    %63 = arith.divf %62, %56 : vector<2x1x1xf32>
    %64 = arith.mulf %53, %37 : vector<2x1x128xf32>
    %cst_26 = arith.constant dense<0.000000e+00> : vector<2x1xf32>
    %65 = vector.multi_reduction <add>, %64, %cst_26 [2] : vector<2x1x128xf32> to vector<2x1xf32>
    %66 = vector.shape_cast %65 : vector<2x1xf32> to vector<2x1x1xf32>
    %67 = arith.divf %66, %59 : vector<2x1x1xf32>
    %68 = arith.addf %63, %67 : vector<2x1x1xf32>
    %69 = math.absf %68 : vector<2x1x1xf32>
    %cst_27 = arith.constant 9.99999993E-9 : f32
    %70 = vector.broadcast %cst_27 : f32 to vector<2x1x1xf32>
    %71 = arith.cmpf olt, %69, %70 : vector<2x1x1xf32>
    %cst_28 = arith.constant 2.000000e+00 : f32
    %72 = vector.broadcast %cst_28 : f32 to vector<2x1x1xf32>
    %73 = arith.mulf %72, %63 : vector<2x1x1xf32>
    %74 = arith.mulf %73, %67 : vector<2x1x1xf32>
    %cst_29 = arith.constant 1.000000e+00 : f32
    %75 = vector.broadcast %cst_29 : f32 to vector<2x1x1xf32>
    %76 = arith.select %71, %75, %68 : vector<2x1x1xi1>, vector<2x1x1xf32>
    %77 = arith.divf %74, %76 : vector<2x1x1xf32>
    %cst_30 = arith.constant 0.000000e+00 : f32
    %78 = vector.broadcast %cst_30 : f32 to vector<2x1x1xf32>
    %79 = arith.select %71, %78, %77 : vector<2x1x1xi1>, vector<2x1x1xf32>
    %cst_31 = arith.constant 8.000000e-01 : f32
    %80 = vector.broadcast %cst_31 : f32 to vector<2x1x1xf32>
    %81 = arith.subf %79, %80 : vector<2x1x1xf32>
    %cst_32 = arith.constant 5.000000e+00 : f32
    %82 = vector.broadcast %cst_32 : f32 to vector<2x1x1xf32>
    %83 = arith.mulf %81, %82 : vector<2x1x1xf32>
    %84 = vector.shape_cast %83 : vector<2x1x1xf32> to vector<2x1x1xf32>
    %85 = vector.broadcast %84 : vector<2x1x1xf32> to vector<2x1x128xf32>
    %c0_33 = arith.constant 0 : index
    %c0_34 = arith.constant 0 : index
    %c0_35 = arith.constant 0 : index
    %86 = vector.load %arg5[%c0_33, %c0_34, %c0_35] : memref<2x1x128xf32, #tpu.memory_space<vmem>>, vector<2x1x128xf32>
    tpu.vector_store %arg5[%c0_33, %c0_34, %c0_35], %85 {strides = array<i32>} : memref<2x1x128xf32, #tpu.memory_space<vmem>>, vector<2x1x128xf32>,
    return
  }
  func.func @transform_0(%arg0: i32) -> (i32, i32, i32) {
    %c0_i32 = arith.constant 0 : i32
    %c0_i32_0 = arith.constant 0 : i32
    %c0_i32_1 = arith.constant 0 : i32
    return %arg0, %c0_i32, %c0_i32_0 : i32, i32, i32
  }
  func.func @transform_1(%arg0: i32) -> (i32, i32, i32) {
    %c0_i32 = arith.constant 0 : i32
    %c0_i32_0 = arith.constant 0 : i32
    %c0_i32_1 = arith.constant 0 : i32
    return %arg0, %c0_i32, %c0_i32_0 : i32, i32, i32
  }
  func.func @transform_2(%arg0: i32) -> (i32, i32, i32) {
    %c0_i32 = arith.constant 0 : i32
    %c0_i32_0 = arith.constant 0 : i32
    %c0_i32_1 = arith.constant 0 : i32
    return %arg0, %c0_i32, %c0_i32_0 : i32, i32, i32
  }
  func.func @transform_3(%arg0: i32) -> (i32, i32, i32) {
    %c0_i32 = arith.constant 0 : i32
    %c0_i32_0 = arith.constant 0 : i32
    %c0_i32_1 = arith.constant 0 : i32
    return %arg0, %c0_i32, %c0_i32_0 : i32, i32, i32
  }
  func.func @transform_4(%arg0: i32) -> (i32, i32, i32) {
    %c0_i32 = arith.constant 0 : i32
    %c0_i32_0 = arith.constant 0 : i32
    %c0_i32_1 = arith.constant 0 : i32
    return %arg0, %c0_i32, %c0_i32_0 : i32, i32, i32
  }
}

</mosaic_0001>

<bundles_post_ra>
// kernel: bert_score_f.1
= control target key start
LH: loop header
LB: loop body
LE: loop exit
PB: predicated region body
PF: predicated region fallthrough
CT: control target
= control target key end

     0   :  { %v875_v54 = vmov 0.0   ;;  %vm418_vm0 = vcmask 1040384   ;;  %vm876_vm1 = vmmov 0   ;;  %s1260_s1 = inlined_call_operand.vmem [shape: bf16[2,128,128], index: 1, kind: input, shape index: {}]   ;;  %s1261_s2 = inlined_call_operand.vmem [shape: s32[2,1,128], index: 2, kind: input, shape index: {}]   ;;  %s1262_s3 = inlined_call_operand.vmem [shape: s32[2,1,128], index: 3, kind: input, shape index: {}]   ;;  %s1263_s0 = inlined_call_operand.vmem [shape: bf16[2,16,128], index: 0, kind: input, shape index: {}]   ;;  %s1264_s4 = inlined_call_operand.vmem [shape: f32[2,1,128], index: 4, kind: output, shape index: {}]  }
   0x1   :  { %v726_v0 = vld [vmem:[%s1260_s1 + $0x78] sm:$0xff]   ;;  %v717_v6 = vld [vmem:[%s1260_s1 + $0x30] sm:$0xff]   ;;  %v716_v18 = vld [vmem:[%s1260_s1 + $0x28] sm:$0xff]   ;;  %745 = vmatprep.subr.bf16.mxu0 %v875_v54  ;;  %765 = vmatprep.subr.bf16.mxu1 %v875_v54 }
   0x2   :  { %v718_v1 = vld [vmem:[%s1260_s1 + $0x38] sm:$0xff]   ;;  %v908_v2 = vunpack.c.l.bf16 %v726_v0  ;;  %v912_v4 = vunpack.c.h.bf16 %v726_v0  ;;  %v927_v11 = vunpack.c.h.bf16 %v717_v6  ;;  %v929_v12 = vunpack.c.l.bf16 %v717_v6  ;;  %v725_v13 = vld [vmem:[%s1260_s1 + $0x70] sm:$0xff]   ;;  %v724_v23 = vld [vmem:[%s1260_s1 + $0x68] sm:$0xff]   ;;  %761 = vmatprep.mubr.msk.bf16.mxu0 %vm876_vm1, %v875_v54  ;;  %781 = vmatprep.mubr.msk.bf16.mxu1 %vm876_vm1, %v875_v54 }
   0x3   :  { %v910_v3 = vunpack.c.l.bf16 %v718_v1  ;;  %v914_v5 = vunpack.c.h.bf16 %v718_v1  ;;  %v938_v16 = vunpack.c.h.bf16 %v725_v13  ;;  %v940_v17 = vunpack.c.l.bf16 %v725_v13  ;;  %v715_v28 = vld [vmem:[%s1260_s1 + $0x20] sm:$0xff]   ;;  %v714_v38 = vld [vmem:[%s1260_s1 + $0x18] sm:$0xff]   ;;  %v713_v48 = vld [vmem:[%s1260_s1 + $0x10] sm:$0xff]  }
   0x4   :  { %v116_v7 = vmul.f32 %v908_v2, %v908_v2  ;;  %v117_v9 = vmul.f32 %v912_v4, %v912_v4  ;;  %v99_v14 = vmul.f32 %v927_v11, %v927_v11  ;;  %v98_v15 = vmul.f32 %v929_v12, %v929_v12  ;;  %v723_v33 = vld [vmem:[%s1260_s1 + $0x60] sm:$0xff]   ;;  %v722_v43 = vld [vmem:[%s1260_s1 + $0x58] sm:$0xff]   ;;  %v721_v53 = vld [vmem:[%s1260_s1 + $0x50] sm:$0xff]  }
   0x5   :  { %v100_v8 = vmul.f32 %v910_v3, %v910_v3  ;;  %v101_v10 = vmul.f32 %v914_v5, %v914_v5  ;;  %v115_v19 = vmul.f32 %v938_v16, %v938_v16  ;;  %v114_v20 = vmul.f32 %v940_v17, %v940_v17  ;;  %v712_v59 = vld [vmem:[%s1260_s1 + $0x8] sm:$0xff]  }
   0x6   :  { %178 = vadd.xlane.f32.xlu1 %v116_v7  ;;  %v949_v21 = vunpack.c.h.bf16 %v716_v18  ;;  %v951_v22 = vunpack.c.l.bf16 %v716_v18  ;;  %v960_v26 = vunpack.c.h.bf16 %v724_v23  ;;  %v962_v27 = vunpack.c.l.bf16 %v724_v23  ;;  %v720_v0 = vld [vmem:[%s1260_s1 + $0x48] sm:$0xff]   ;;  %v719_v18 = vld [vmem:[%s1260_s1 + $0x40] sm:$0xff]  }
   0x7   :  { %146 = vadd.xlane.f32.xlu0 %v100_v8  ;;  %v971_v31 = vunpack.c.h.bf16 %v715_v28  ;;  %v973_v32 = vunpack.c.l.bf16 %v715_v28  ;;  %v982_v36 = vunpack.c.h.bf16 %v723_v33  ;;  %v984_v37 = vunpack.c.l.bf16 %v723_v33  ;;  %v450_v33 = vld [vmem:[%s1262_s3 + $0x1] sm:$0x1] }
   0x8   :  { %v97_v24 = vmul.f32 %v949_v21, %v949_v21  ;;  %v96_v25 = vmul.f32 %v951_v22, %v951_v22  ;;  %v113_v29 = vmul.f32 %v960_v26, %v960_v26  ;;  %v112_v30 = vmul.f32 %v962_v27, %v962_v27 }
   0x9   :  { %v95_v34 = vmul.f32 %v971_v31, %v971_v31  ;;  %v94_v35 = vmul.f32 %v973_v32, %v973_v32  ;;  %v111_v39 = vmul.f32 %v982_v36, %v982_v36  ;;  %v110_v40 = vmul.f32 %v984_v37, %v984_v37 }
   0xa   :  { %180 = vadd.xlane.f32.xlu1 %v117_v9  ;;  %v993_v41 = vunpack.c.h.bf16 %v714_v38  ;;  %v995_v42 = vunpack.c.l.bf16 %v714_v38  ;;  %v1004_v46 = vunpack.c.h.bf16 %v722_v43  ;;  %v1006_v47 = vunpack.c.l.bf16 %v722_v43  ;;  %v649_v9 = vld [vmem:[%s1260_s1] sm:$0xff]  }
   0xb   :  { %148 = vadd.xlane.f32.xlu0 %v101_v10  ;;  %v1015_v51 = vunpack.c.h.bf16 %v713_v48  ;;  %v1017_v52 = vunpack.c.l.bf16 %v713_v48  ;;  %v1028_v57 = vunpack.c.h.bf16 %v721_v53  ;;  %v1030_v58 = vunpack.c.l.bf16 %v721_v53 }
   0xc   :  { %v93_v44 = vmul.f32 %v993_v41, %v993_v41  ;;  %v92_v45 = vmul.f32 %v995_v42, %v995_v42  ;;  %v109_v49 = vmul.f32 %v1004_v46, %v1004_v46  ;;  %v108_v50 = vmul.f32 %v1006_v47, %v1006_v47 }
   0xd   :  { %v91_v55 = vmul.f32 %v1015_v51, %v1015_v51  ;;  %v90_v56 = vmul.f32 %v1017_v52, %v1017_v52  ;;  %v107_v60 = vmul.f32 %v1028_v57, %v1028_v57  ;;  %v106_v61 = vmul.f32 %v1030_v58, %v1030_v58 }
   0xe   :  { %144 = vadd.xlane.f32.xlu1 %v99_v14  ;;  %v1039_v62 = vunpack.c.h.bf16 %v712_v59  ;;  %v1041_v63 = vunpack.c.l.bf16 %v712_v59  ;;  %v1050_v7 = vunpack.c.h.bf16 %v720_v0  ;;  %v1052_v8 = vunpack.c.l.bf16 %v720_v0 }
   0xf   :  { %142 = vadd.xlane.f32.xlu0 %v98_v15  ;;  %v1061_v14 = vunpack.c.h.bf16 %v649_v9  ;;  %v1063_v15 = vunpack.c.l.bf16 %v649_v9  ;;  %v1080_v28 = vunpack.c.l.bf16 %v719_v18  ;;  %v1101_v43 = vsel %vm418_vm0, %v450_v33, 2147483648 }
  0x10   :  { %v89_v1 = vmul.f32 %v1039_v62, %v1039_v62  ;;  %v88_v6 = vmul.f32 %v1041_v63, %v1041_v63  ;;  %v105_v10 = vmul.f32 %v1050_v7, %v1050_v7  ;;  %v104_v13 = vmul.f32 %v1052_v8, %v1052_v8 }
  0x11   :  { %v87_v23 = vmul.f32 %v1061_v14, %v1061_v14  ;;  %v102_v38 = vmul.f32 %v1080_v28, %v1080_v28 }
  0x12   :  { %176 = vadd.xlane.f32.xlu1 %v115_v19  ;;  %v417_v19 = vld [vmem:[%s1261_s2 + $0x1] sm:$0x1] }
  0x13   :  { %174 = vadd.xlane.f32.xlu0 %v114_v20  ;;  %v416_v20 = vld [vmem:[%s1261_s2] sm:$0x1] }
  0x16   :  { %140 = vadd.xlane.f32.xlu1 %v97_v24  ;;  %v86_v24 = vmul.f32 %v1063_v15, %v1063_v15 }
  0x17   :  { %138 = vadd.xlane.f32.xlu0 %v96_v25  ;;  %v1078_v25 = vunpack.c.h.bf16 %v719_v18 }
  0x1a   :  { %172 = vadd.xlane.f32.xlu1 %v113_v29  ;;  %v1083_v29 = vsel %vm418_vm0, %v417_v19, 2147483648 }
  0x1b   :  { %170 = vadd.xlane.f32.xlu0 %v112_v30  ;;  %v1086_v30 = vsel %vm418_vm0, %v416_v20, 2147483648 }
  0x1e   :  { %136 = vadd.xlane.f32.xlu1 %v95_v34  ;;  %v449_v34 = vld [vmem:[%s1262_s3] sm:$0x1] }
  0x1f   :  { %134 = vadd.xlane.f32.xlu0 %v94_v35  ;;  %v103_v35 = vmul.f32 %v1078_v25, %v1078_v25 }
  0x22   :  { %168 = vadd.xlane.f32.xlu1 %v111_v39  ;;  %v436_v39 = vshra.s32 %v1083_v29, 16 }
  0x23   :  { %166 = vadd.xlane.f32.xlu0 %v110_v40  ;;  %v421_v40 = vshra.s32 %v1086_v30, 16 }
  0x25   :  { %v1108_v48 = vcvt.s32.f32 %v421_v40 }
  0x26   :  { %132 = vadd.xlane.f32.xlu1 %v93_v44  ;;  %v1104_v44 = vsel %vm418_vm0, %v449_v34, 2147483648 }
  0x27   :  { %130 = vadd.xlane.f32.xlu0 %v92_v45  ;;  %v1106_v45 = vcvt.s32.f32 %v436_v39 }
  0x2a   :  { %164 = vadd.xlane.f32.xlu1 %v109_v49  ;;  %v468_v49 = vshra.s32 %v1101_v43, 16 }
  0x2b   :  { %162 = vadd.xlane.f32.xlu0 %v108_v50  ;;  %v453_v50 = vshra.s32 %v1104_v44, 16 }
  0x2c   :  { %v1114_v53 = vcvt.s32.f32 %v468_v49 }
  0x2e   :  { %128 = vadd.xlane.f32.xlu1 %v91_v55  ;;  %v1116_v55 = vcvt.s32.f32 %v453_v50 }
  0x2f   :  { %126 = vadd.xlane.f32.xlu0 %v90_v56  ;;  %v1121_v56 = vld [vmem:[%s1263_s0] sm:$0xff]  }
  0x30   :  { %v389_v59 = vunpack.c.h.bf16 %v1121_v56 }
  0x32   :  { %160 = vadd.xlane.f32.xlu1 %v107_v60  ;;  %v388_v60 = vunpack.c.l.bf16 %v1121_v56 }
  0x33   :  { %158 = vadd.xlane.f32.xlu0 %v106_v61  ;;  %v393_v61 = vmul.f32 %v389_v59, %v389_v59 }
  0x34   :  { %v392_v0 = vmul.f32 %v388_v60, %v388_v60 }
  0x36   :  { %124 = vadd.xlane.f32.xlu1 %v89_v1  ;;  %v1130_v1 = vld [vmem:[%s1263_s0 + $0x8] sm:$0xff]  }
  0x37   :  { %122 = vadd.xlane.f32.xlu0 %v88_v6  ;;  %v391_v6 = vunpack.c.h.bf16 %v1130_v1  ;;  %v390_v9 = vunpack.c.l.bf16 %v1130_v1 }
  0x3a   :  { %156 = vadd.xlane.f32.xlu1 %v105_v10  ;;  %v395_v10 = vmul.f32 %v391_v6, %v391_v6 }
  0x3b   :  { %154 = vadd.xlane.f32.xlu0 %v104_v13  ;;  %v394_v13 = vmul.f32 %v390_v9, %v390_v9 }
  0x3e   :  { %120 = vadd.xlane.f32.xlu1 %v87_v23 }
  0x3f   :  { %118 = vadd.xlane.f32.xlu0 %v86_v24 }
  0x42   :  { %152 = vadd.xlane.f32.xlu1 %v103_v35 }
  0x43   :  { %150 = vadd.xlane.f32.xlu0 %v102_v38 }
  0x46   :  { %439 = vmax.xlane.f32.xlu1 %v1106_v45 }
  0x47   :  { %424 = vmax.xlane.f32.xlu0 %v1108_v48 }
  0x4a   :  { %471 = vmax.xlane.f32.xlu1 %v1114_v53 }
  0x4b   :  { %456 = vmax.xlane.f32.xlu0 %v1116_v55 }
  0x4e   :  { %398 = vadd.xlane.f32.xlu1 %v393_v61 }
  0x4f   :  { %396 = vadd.xlane.f32.xlu0 %v392_v0 }
  0x52   :  { %402 = vadd.xlane.f32.xlu1 %v395_v10 }
  0x53   :  { %400 = vadd.xlane.f32.xlu0 %v394_v13 }
  0x8f   :  { %v179_v18 = vpop.xlane.xlu1 %178 }
  0x90   :  { %v147_v19 = vpop.xlane.xlu0 %146  ;;  %v212_v20 = vadd.f32 1e-12, %v179_v18 }
  0x91   :  { %v196_v23 = vadd.f32 1e-12, %v147_v19 }
  0x92   :  { %791 = vrsqrt.f32 %v212_v20 }
  0x93   :  { %v181_v24 = vpop.xlane.xlu1 %180  ;;  %793 = vrsqrt.f32 %v196_v23 }
  0x94   :  { %v149_v33 = vpop.xlane.xlu0 %148  ;;  %v213_v34 = vadd.f32 1e-12, %v181_v24 }
  0x95   :  { %v197_v35 = vadd.f32 1e-12, %v149_v33 }
  0x96   :  { %795 = vrsqrt.f32 %v213_v34 }
  0x97   :  { %797 = vrsqrt.f32 %v197_v35  ;;  %v145_v38 = vpop.xlane.xlu1 %144 }
  0x98   :  { %v143_v39 = vpop.xlane.xlu0 %142  ;;  %v195_v40 = vadd.f32 1e-12, %v145_v38 }
  0x99   :  { %v194_v49 = vadd.f32 1e-12, %v143_v39 }
  0x9a   :  { %799 = vrsqrt.f32 %v195_v40 }
  0x9b   :  { %801 = vrsqrt.f32 %v194_v49  ;;  %v177_v50 = vpop.xlane.xlu1 %176 }
  0x9c   :  { %v175_v59 = vpop.xlane.xlu0 %174  ;;  %v211_v60 = vadd.f32 1e-12, %v177_v50 }
  0x9d   :  { %v210_v61 = vadd.f32 1e-12, %v175_v59 }
  0x9e   :  { %803 = vrsqrt.f32 %v211_v60 }
  0x9f   :  { %v792_v0 = vpop.eup %791  ;;  %805 = vrsqrt.f32 %v210_v61  ;;  %v141_v6 = vpop.xlane.xlu1 %140 }
  0xa0   :  { %v139_v9 = vpop.xlane.xlu0 %138  ;;  %v193_v10 = vadd.f32 1e-12, %v141_v6  ;;  %v794_v18 = vpop.eup %793  ;;  %v276_v19 = vmul.f32 %v792_v0, %v908_v2 }
  0xa1   :  { %v192_v13 = vadd.f32 1e-12, %v139_v9  ;;  %v260_v39 = vmul.f32 %v794_v18, %v910_v3 }
  0xa2   :  { %807 = vrsqrt.f32 %v193_v10 }
  0xa3   :  { %v796_v20 = vpop.eup %795  ;;  %809 = vrsqrt.f32 %v192_v13  ;;  %v173_v23 = vpop.xlane.xlu1 %172 }
  0xa4   :  { %v171_v24 = vpop.xlane.xlu0 %170  ;;  %v798_v33 = vpop.eup %797  ;;  %v209_v34 = vadd.f32 1e-12, %v173_v23  ;;  %v277_v38 = vmul.f32 %v796_v20, %v912_v4 }
  0xa5   :  { %v208_v35 = vadd.f32 1e-12, %v171_v24  ;;  %v261_v40 = vmul.f32 %v798_v33, %v914_v5 }
  0xa6   :  { %811 = vrsqrt.f32 %v209_v34  ;;  %v293_v49 = vpack.c.bf16 %v277_v38, %v276_v19 }
  0xa7   :  { %v800_v50 = vpop.eup %799  ;;  %813 = vrsqrt.f32 %v208_v35  ;;  %v137_v59 = vpop.xlane.xlu1 %136  ;;  %v285_v2 = vpack.c.bf16 %v261_v40, %v260_v39 }
  0xa8   :  { %v135_v60 = vpop.xlane.xlu0 %134  ;;  %v802_v61 = vpop.eup %801  ;;  %v191_v0 = vadd.f32 1e-12, %v137_v59  ;;  %766 = vmatpush3.bf16.xpose.msra.mxu1 %v293_v49  ;;  %v259_v3 = vmul.f32 %v800_v50, %v927_v11 }
  0xa9   :  { %v190_v6 = vadd.f32 1e-12, %v135_v60  ;;  %746 = vmatpush3.bf16.xpose.msra.mxu0 %v285_v2  ;;  %767 = vmatprep.subr.bf16.mxu1 %v875_v54  ;;  %v258_v4 = vmul.f32 %v802_v61, %v929_v12 }
  0xaa   :  { %815 = vrsqrt.f32 %v191_v0  ;;  %747 = vmatprep.subr.bf16.mxu0 %v875_v54 }
  0xab   :  { %v804_v5 = vpop.eup %803  ;;  %817 = vrsqrt.f32 %v190_v6  ;;  %v169_v9 = vpop.xlane.xlu1 %168  ;;  %v284_v23 = vpack.c.bf16 %v259_v3, %v258_v4 }
  0xac   :  { %v167_v10 = vpop.xlane.xlu0 %166  ;;  %v806_v13 = vpop.eup %805  ;;  %v207_v18 = vadd.f32 1e-12, %v169_v9  ;;  %v275_v20 = vmul.f32 %v804_v5, %v938_v16 }
  0xad   :  { %v206_v19 = vadd.f32 1e-12, %v167_v10  ;;  %v274_v24 = vmul.f32 %v806_v13, %v940_v17 }
  0xae   :  { %819 = vrsqrt.f32 %v207_v18 }
  0xaf   :  { %v808_v33 = vpop.eup %807  ;;  %821 = vrsqrt.f32 %v206_v19  ;;  %v133_v12 = vpop.xlane.xlu1 %132  ;;  %v292_v34 = vpack.c.bf16 %v275_v20, %v274_v24 }
  0xb0   :  { %v131_v11 = vpop.xlane.xlu0 %130  ;;  %v810_v35 = vpop.eup %809  ;;  %v189_v38 = vadd.f32 1e-12, %v133_v12  ;;  %v257_v49 = vmul.f32 %v808_v33, %v949_v21 }
  0xb1   :  { %v188_v39 = vadd.f32 1e-12, %v131_v11  ;;  %748 = vmatpush3.bf16.xpose.msra.mxu0 %v284_v23  ;;  %768 = vmatpush3.bf16.xpose.msra.mxu1 %v292_v34  ;;  %v256_v40 = vmul.f32 %v810_v35, %v951_v22 }
  0xb2   :  { %823 = vrsqrt.f32 %v189_v38  ;;  %749 = vmatprep.subr.bf16.mxu0 %v875_v54  ;;  %769 = vmatprep.subr.bf16.mxu1 %v875_v54 }
  0xb3   :  { %v812_v16 = vpop.eup %811  ;;  %825 = vrsqrt.f32 %v188_v39  ;;  %v165_v17 = vpop.xlane.xlu1 %164  ;;  %v283_v0 = vpack.c.bf16 %v257_v49, %v256_v40 }
  0xb4   :  { %v163_v50 = vpop.xlane.xlu0 %162  ;;  %v814_v59 = vpop.eup %813  ;;  %v205_v60 = vadd.f32 1e-12, %v165_v17  ;;  %v273_v61 = vmul.f32 %v812_v16, %v960_v26 }
  0xb5   :  { %v204_v2 = vadd.f32 1e-12, %v163_v50  ;;  %v272_v6 = vmul.f32 %v814_v59, %v962_v27 }
  0xb6   :  { %827 = vrsqrt.f32 %v205_v60 }
  0xb7   :  { %v816_v22 = vpop.eup %815  ;;  %829 = vrsqrt.f32 %v204_v2  ;;  %v129_v21 = vpop.xlane.xlu1 %128  ;;  %v291_v3 = vpack.c.bf16 %v273_v61, %v272_v6 }
  0xb8   :  { %v127_v4 = vpop.xlane.xlu0 %126  ;;  %v818_v5 = vpop.eup %817  ;;  %v187_v9 = vadd.f32 1e-12, %v129_v21  ;;  %v255_v18 = vmul.f32 %v816_v22, %v971_v31 }
  0xb9   :  { %v186_v10 = vadd.f32 1e-12, %v127_v4  ;;  %750 = vmatpush3.bf16.xpose.msra.mxu0 %v283_v0  ;;  %770 = vmatpush3.bf16.xpose.msra.mxu1 %v291_v3  ;;  %v254_v13 = vmul.f32 %v818_v5, %v973_v32 }
  0xba   :  { %831 = vrsqrt.f32 %v187_v9  ;;  %751 = vmatprep.subr.bf16.mxu0 %v875_v54  ;;  %771 = vmatprep.subr.bf16.mxu1 %v875_v54 }
  0xbb   :  { %v820_v26 = vpop.eup %819  ;;  %833 = vrsqrt.f32 %v186_v10  ;;  %v161_v27 = vpop.xlane.xlu1 %160  ;;  %v282_v12 = vpack.c.bf16 %v255_v18, %v254_v13  ;;  %v420_v10 = vand.u32 65535, %v1086_v30 }
  0xbc   :  { %v159_v19 = vpop.xlane.xlu0 %158  ;;  %v822_v20 = vpop.eup %821  ;;  %v203_v23 = vadd.f32 1e-12, %v161_v27  ;;  %v271_v33 = vmul.f32 %v820_v26, %v982_v36  ;;  %v467_v26 = vand.u32 65535, %v1101_v43 }
  0xbd   :  { %v202_v24 = vadd.f32 1e-12, %v159_v19  ;;  %v270_v11 = vmul.f32 %v822_v20, %v984_v37 }
  0xbe   :  { %835 = vrsqrt.f32 %v203_v23 }
  0xbf   :  { %v824_v32 = vpop.eup %823  ;;  %837 = vrsqrt.f32 %v202_v24  ;;  %v125_v31 = vpop.xlane.xlu1 %124  ;;  %v290_v35 = vpack.c.bf16 %v271_v33, %v270_v11  ;;  %v422_v24 = vcvt.s32.f32 %v420_v10 }
  0xc0   :  { %v123_v34 = vpop.xlane.xlu0 %122  ;;  %v826_v38 = vpop.eup %825  ;;  %v185_v39 = vadd.f32 1e-12, %v125_v31  ;;  %v253_v16 = vmul.f32 %v824_v32, %v993_v41 }
  0xc1   :  { %v184_v40 = vadd.f32 1e-12, %v123_v34  ;;  %752 = vmatpush3.bf16.xpose.msra.mxu0 %v282_v12  ;;  %772 = vmatpush3.bf16.xpose.msra.mxu1 %v290_v35  ;;  %v252_v49 = vmul.f32 %v826_v38, %v995_v42 }
  0xc2   :  { %839 = vrsqrt.f32 %v185_v39  ;;  %753 = vmatprep.subr.bf16.mxu0 %v875_v54  ;;  %773 = vmatprep.subr.bf16.mxu1 %v875_v54 }
  0xc3   :  { %v828_v36 = vpop.eup %827  ;;  %841 = vrsqrt.f32 %v184_v40  ;;  %v157_v37 = vpop.xlane.xlu1 %156  ;;  %v281_v61 = vpack.c.bf16 %v253_v16, %v252_v49 }
  0xc4   :  { %v155_v17 = vpop.xlane.xlu0 %154  ;;  %v830_v50 = vpop.eup %829  ;;  %v201_v59 = vadd.f32 1e-12, %v157_v37  ;;  %v269_v2 = vmul.f32 %v828_v36, %v1004_v46  ;;  %v435_v46 = vand.u32 65535, %v1083_v29  ;;  %v452_v29 = vand.u32 65535, %v1104_v44 }
  0xc5   :  { %v200_v60 = vadd.f32 1e-12, %v155_v17  ;;  %v268_v0 = vmul.f32 %v830_v50, %v1006_v47 }
  0xc6   :  { %843 = vrsqrt.f32 %v201_v59  ;;  %v437_v23 = vcvt.s32.f32 %v435_v46  ;;  %v454_v44 = vcvt.s32.f32 %v452_v29 }
  0xc7   :  { %v832_v42 = vpop.eup %831  ;;  %845 = vrsqrt.f32 %v200_v60  ;;  %v121_v41 = vpop.xlane.xlu1 %120  ;;  %v289_v22 = vpack.c.bf16 %v269_v2, %v268_v0 }
  0xc8   :  { %v119_v6 = vpop.xlane.xlu0 %118  ;;  %v834_v21 = vpop.eup %833  ;;  %v183_v4 = vadd.f32 1e-12, %v121_v41  ;;  %v251_v9 = vmul.f32 %v832_v42, %v1015_v51  ;;  %v481_v41 = vlaneseq }
  0xc9   :  { %v182_v3 = vadd.f32 1e-12, %v119_v6  ;;  %754 = vmatpush3.bf16.xpose.msra.mxu0 %v281_v61  ;;  %774 = vmatpush3.bf16.xpose.msra.mxu1 %v289_v22  ;;  %v250_v5 = vmul.f32 %v834_v21, %v1017_v52 }
  0xca   :  { %847 = vrsqrt.f32 %v183_v4  ;;  %755 = vmatprep.subr.bf16.mxu0 %v875_v54  ;;  %775 = vmatprep.subr.bf16.mxu1 %v875_v54  ;;  %v482_v21 = vshrl.u32 %v481_v41, 7  ;;  %v485_v29 = vand.u32 127, %v481_v41 }
  0xcb   :  { %v836_v47 = vpop.eup %835  ;;  %849 = vrsqrt.f32 %v182_v3  ;;  %v153_v13 = vpop.xlane.xlu1 %152  ;;  %v280_v20 = vpack.c.bf16 %v251_v9, %v250_v5 }
  0xcc   :  { %v151_v18 = vpop.xlane.xlu0 %150  ;;  %v838_v27 = vpop.eup %837  ;;  %v199_v19 = vadd.f32 1e-12, %v153_v13  ;;  %v267_v51 = vmul.f32 %v836_v47, %v1028_v57  ;;  %v469_v57 = vcvt.s32.f32 %v467_v26  ;;  %v1203_v47 = vsub.s32 0, %v482_v21 }
  0xcd   :  { %v198_v52 = vadd.f32 1e-12, %v151_v18  ;;  %v266_v30 = vmul.f32 %v838_v27, %v1030_v58 }
  0xce   :  { %851 = vrsqrt.f32 %v199_v19 }
  0xcf   :  { %v840_v33 = vpop.eup %839  ;;  %853 = vrsqrt.f32 %v198_v52  ;;  %v1174_v12 = vpop.xlane.xlu1 %439  ;;  %v288_v43 = vpack.c.bf16 %v267_v51, %v266_v30 }
  0xd0   :  { %v1176_v11 = vpop.xlane.xlu0 %424  ;;  %v842_v32 = vpop.eup %841  ;;  %vm441_vm2 = vcmp.eq.f32.partialorder %v1106_v45, %v1174_v12  ;;  %v249_v35 = vmul.f32 %v840_v33, %v1039_v62 }
  0xd1   :  { %vm426_vm3 = vcmp.eq.f32.partialorder %v1108_v48, %v1176_v11  ;;  %756 = vmatpush3.bf16.xpose.msra.mxu0 %v280_v20  ;;  %776 = vmatpush3.bf16.xpose.msra.mxu1 %v288_v43  ;;  %v442_v58 = vsel %vm441_vm2, %v437_v23, -inf  ;;  %v248_v34 = vmul.f32 %v842_v32, %v1041_v63  ;;  %v431_v22 = vcvt.f32.s32 %v1176_v11 }
  0xd2   :  { %v427_v31 = vsel %vm426_vm3, %v422_v24, -inf  ;;  %443 = vmax.xlane.f32.xlu1 %v442_v58  ;;  %757 = vmatprep.subr.bf16.mxu0 %v875_v54  ;;  %v483_v11 = vadd.s32 8, %v482_v21 }
  0xd3   :  { %428 = vmax.xlane.f32.xlu0 %v427_v31  ;;  %v844_v38 = vpop.eup %843  ;;  %v1184_v39 = vpop.xlane.xlu1 %471  ;;  %777 = vmatprep.subr.bf16.mxu1 %v875_v54  ;;  %v279_v48 = vpack.c.bf16 %v249_v35, %v248_v34 }
  0xd4   :  { %v457_v40 = vpop.xlane.xlu0 %456  ;;  %v846_v45 = vpop.eup %845  ;;  %vm473_vm4 = vcmp.eq.f32.partialorder %v1114_v53, %v1184_v39  ;;  %v265_v16 = vmul.f32 %v844_v38, %v1050_v7  ;;  %v478_v18 = vcvt.f32.s32 %v1184_v39 }
  0xd5   :  { %vm458_vm5 = vcmp.eq.f32.partialorder %v1116_v55, %v457_v40  ;;  %v474_v63 = vsel %vm473_vm4, %v469_v57, -inf  ;;  %v264_v62 = vmul.f32 %v846_v45, %v1052_v8  ;;  %v463_v4 = vcvt.f32.s32 %v457_v40 }
  0xd6   :  { %v459_v49 = vsel %vm458_vm5, %v454_v44, -inf  ;;  %475 = vmax.xlane.f32.xlu1 %v474_v63  ;;  %v479_v23 = vshll.u32 %v478_v18, 16 }
  0xd7   :  { %460 = vmax.xlane.f32.xlu0 %v459_v49  ;;  %v848_v36 = vpop.eup %847  ;;  %v287_v37 = vpack.c.bf16 %v265_v16, %v264_v62  ;;  %v464_v26 = vshll.u32 %v463_v4, 16 }
  0xd8   :  { %v850_v17 = vpop.eup %849  ;;  %v247_v53 = vmul.f32 %v848_v36, %v1061_v14  ;;  %v399_v14 = vpop.xlane.xlu1 %398 }
  0xd9   :  { %758 = vmatpush3.bf16.xpose.msra.mxu0 %v279_v48  ;;  %778 = vmatpush3.bf16.xpose.msra.mxu1 %v287_v37  ;;  %v246_v50 = vmul.f32 %v850_v17, %v1063_v15  ;;  %v397_v15 = vpop.xlane.xlu0 %396  ;;  %v405_v19 = vadd.f32 1e-12, %v399_v14 }
  0xda   :  { %759 = vmatprep.subr.bf16.mxu0 %v875_v54  ;;  %779 = vmatprep.subr.bf16.mxu1 %v875_v54  ;;  %v404_v3 = vadd.f32 1e-12, %v397_v15 }
  0xdb   :  { %v852_v55 = vpop.eup %851  ;;  %v278_v7 = vpack.c.bf16 %v247_v53, %v246_v50 }
  0xdc   :  { %v854_v59 = vpop.eup %853  ;;  %v263_v8 = vmul.f32 %v852_v55, %v1078_v25  ;;  %v403_v0 = vpop.xlane.xlu1 %402  ;;  %v446_v25 = vcvt.f32.s32 %v1174_v12  ;;  %855 = vrsqrt.f32 %v404_v3 }
  0xdd   :  { %v262_v60 = vmul.f32 %v854_v59, %v1080_v28  ;;  %v401_v61 = vpop.xlane.xlu0 %400  ;;  %v407_v52 = vadd.f32 1e-12, %v403_v0 }
  0xde   :  { %v406_v9 = vadd.f32 1e-12, %v401_v61  ;;  %v447_v10 = vshll.u32 %v446_v25, 16 }
  0xdf   :  { %v286_v2 = vpack.c.bf16 %v263_v8, %v262_v60 }
  0xe0   :  { %857 = vrsqrt.f32 %v406_v9 }
  0xe1   :  { %760 = vmatpush3.bf16.xpose.msra.mxu0 %v278_v7  ;;  %780 = vmatpush3.bf16.xpose.msra.mxu1 %v286_v2  ;;  %859 = vrsqrt.f32 %v405_v19 }
  0xe2   :  { %861 = vrsqrt.f32 %v407_v52 }
  0xe8   :  { %762 = vmatmul.mubr.bf16.vlgmr.msra.gmra.mxu0 %v1121_v56  ;;  %782 = vmatmul.mubr.bf16.vlgmr.msra.gmra.mxu1 %v1130_v1  ;;  %v432_v56 = vshll.u32 %v431_v22, 16 }
  0xe9   :  { %v856_v44 = vpop.eup %855 }
  0xed   :  { %v858_v34 = vpop.eup %857 }
  0xee   :  { %v860_v36 = vpop.eup %859 }
  0xef   :  { %v862_v53 = vpop.eup %861 }
 0x15b   :  { %v444_v6 = vpop.xlane.xlu1 %443 }
 0x15c   :  { %v429_v42 = vpop.xlane.xlu0 %428  ;;  %v445_v46 = vcvt.f32.s32 %v444_v6 }
 0x15d   :  { %v430_v5 = vcvt.f32.s32 %v429_v42 }
 0x15e   :  { %v1208_v51 = vadd.s32 %v447_v10, %v445_v46 }
 0x15f   :  { %v476_v13 = vpop.xlane.xlu1 %475  ;;  %v1206_v27 = vadd.s32 %v432_v56, %v430_v5 }
 0x160   :  { %v461_v28 = vpop.xlane.xlu0 %460  ;;  %v477_v20 = vcvt.f32.s32 %v476_v13  ;;  %v493_v33 = vrot.slane %v1208_v51, %v1203_v47 }
 0x161   :  { %v462_v1 = vcvt.f32.s32 %v461_v28  ;;  %v489_v24 = vrot.slane %v1206_v27, %v1203_v47 }
 0x162   :  { %v1216_v12 = vadd.s32 %v479_v23, %v477_v20  ;;  %vm496_vm8 = vcmp.lt.s32.totalorder %v482_v21, %v493_v33  ;;  %vm497_vm10 = vcmp.lt.s32.totalorder %v483_v11, %v493_v33 }
 0x163   :  { %v1210_v30 = vadd.s32 %v464_v26, %v462_v1  ;;  %vm494_vm7 = vcmp.lt.s32.totalorder %v482_v21, %v489_v24  ;;  %vm495_vm11 = vcmp.lt.s32.totalorder %v483_v11, %v489_v24  ;;  %v1229_v31 = vsel %vm496_vm8, 1.0, %v875_v54 }
 0x164   :  { %vm507_vm9 = vcmp.lt.s32.totalorder %v485_v29, %v1216_v12  ;;  %v1224_v32 = vsel %vm494_vm7, 1.0, %v875_v54  ;;  %v1233_v38 = vsel %vm495_vm11, 1.0, %v875_v54  ;;  %v1236_v39 = vsel %vm497_vm10, 1.0, %v875_v54 }
 0x165   :  { %vm506_vm6 = vcmp.lt.s32.totalorder %v485_v29, %v1210_v30  ;;  %v639_v58 = vsel %vm507_vm9, 1.0, %v875_v54  ;;  %v640_v35 = vadd.f32 -1.0, %v1224_v32  ;;  %v642_v40 = vadd.f32 -1.0, %v1229_v31 }
 0x166   :  { %v1220_v43 = vsel %vm506_vm6, 1.0, %v875_v54  ;;  %v645_v48 = vadd.f32 -1.0, %v639_v58  ;;  %v641_v62 = vadd.f32 -1.0, %v1233_v38  ;;  %v643_v16 = vadd.f32 -1.0, %v1236_v39 }
 0x167   :  { %v644_v57 = vadd.f32 -1.0, %v1220_v43  ;;  %v516_v17 = vmul.f32 1e+09, %v640_v35  ;;  %v518_v54 = vmul.f32 1e+09, %v642_v40  ;;  %v566_v35 = vcvt.s32.f32 %v1210_v30 }
 0x168   :  { %v527_v60 = vmul.f32 1e+09, %v645_v48  ;;  %v517_v15 = vmul.f32 1e+09, %v641_v62  ;;  %v519_v61 = vmul.f32 1e+09, %v643_v16 }
 0x169   :  { %v526_v45 = vmul.f32 1e+09, %v644_v57 }
 0x16a   :  { %v535_v4 = vrot.slane %v527_v60, %v1203_v47 }
 0x16b   :  { %v531_v7 = vrot.slane %v526_v45, %v1203_v47  ;;  %v563_v45 = vcvt.s32.f32 %v1208_v51 }
 0x16d   :  { %v565_v16 = vmax.f32 %v563_v45, 1.0 }
 0x1a8   :  { %v334_v63 = vpop.f32.mrf.mxu0  ;;  %v381_v49 = vpop.f32.mrf.mxu1 }
 0x1a9   :  { %v412_v37 = vmul.f32 %v856_v44, %v334_v63  ;;  %v414_v50 = vmul.f32 %v858_v34, %v381_v49  ;;  %v562_v34 = vcvt.s32.f32 %v1206_v27  ;;  %v567_v63 = vcvt.s32.f32 %v1216_v12 }
 0x1aa   :  { %v763_v55 = vpop.f32.mrf.mxu0  ;;  %v783_v59 = vpop.f32.mrf.mxu1  ;;  %v568_v49 = vmax.f32 %v566_v35, 1.0 }
 0x1ab   :  { %v520_v8 = vadd.f32 %v516_v17, %v412_v37  ;;  %v522_v0 = vadd.f32 %v518_v54, %v414_v50  ;;  %v564_v48 = vmax.f32 %v562_v34, 1.0  ;;  %v569_v37 = vmax.f32 %v567_v63, 1.0 }
 0x1ac   :  { %v337_v2 = vpop.f32.mrf.mxu0  ;;  %v384_v14 = vpop.f32.mrf.mxu1 }
 0x1ad   :  { %v413_v42 = vmul.f32 %v860_v36, %v337_v2  ;;  %v415_v41 = vmul.f32 %v862_v53, %v384_v14  ;;  %v536_v6 = vadd.f32 %v531_v7, %v520_v8  ;;  %v538_v3 = vadd.f32 %v535_v4, %v522_v0 }
 0x1ae   :  { %v764_v22 = vpop.f32.mrf.mxu0  ;;  %v784_v25 = vpop.f32.mrf.mxu1  ;;  %863 = vrcp.f32 %v564_v48 }
 0x1af   :  { %v521_v21 = vadd.f32 %v517_v15, %v413_v42  ;;  %v523_v28 = vadd.f32 %v519_v61, %v415_v41  ;;  %540 = vmax.xlane.f32.xlu0 %v536_v6  ;;  %865 = vrcp.f32 %v568_v49 }
 0x1b0   :  { %867 = vrcp.f32 %v565_v16 }
 0x1b1   :  { %v537_v5 = vadd.f32 %v531_v7, %v521_v21  ;;  %v539_v9 = vadd.f32 %v535_v4, %v523_v28  ;;  %869 = vrcp.f32 %v569_v37 }
 0x1b3   :  { %544 = vmax.xlane.f32.xlu0 %v538_v3  ;;  %542 = vmax.xlane.f32.xlu1 %v537_v5  ;;  %v548_v56 = vmax.f32 %v536_v6, %v537_v5  ;;  %v555_v46 = vmax.f32 %v538_v3, %v539_v9 }
 0x1b5   :  { %v549_v1 = vrot.slane %v548_v56, 4  ;;  %v556_v10 = vrot.slane %v555_v46, 4 }
 0x1b7   :  { %v550_v13 = vmax.f32 %v548_v56, %v549_v1  ;;  %v557_v18 = vmax.f32 %v555_v46, %v556_v10  ;;  %546 = vmax.xlane.f32.xlu1 %v539_v9 }
 0x1b9   :  { %v551_v26 = vrot.slane %v550_v13, 2  ;;  %v558_v19 = vrot.slane %v557_v18, 2 }
 0x1bb   :  { %v559_v52 = vmax.f32 %v557_v18, %v558_v19  ;;  %v552_v29 = vmax.f32 %v550_v13, %v551_v26  ;;  %v864_v2 = vpop.eup %863 }
 0x1bc   :  { %v866_v15 = vpop.eup %865 }
 0x1bd   :  { %v560_v20 = vrot.slane %v559_v52, 1  ;;  %v553_v23 = vrot.slane %v552_v29, 1 }
 0x1bf   :  { %v561_v24 = vmax.f32 %v559_v52, %v560_v20  ;;  %v554_v47 = vmax.f32 %v552_v29, %v553_v23 }
 0x1c1   :  { %v593_v33 = vmul.f32 %v639_v58, %v561_v24  ;;  %v592_v11 = vmul.f32 %v1220_v43, %v554_v47 }
 0x1c3   :  { %v597_v57 = vsel %vm418_vm0, %v593_v33, 0.0  ;;  %v594_v44 = vsel %vm418_vm0, %v592_v11, 0.0 }
 0x1c4   :  { %598 = vadd.xlane.f32.xlu1 %v597_v57  ;;  %595 = vadd.xlane.f32.xlu0 %v594_v44 }
 0x238   :  { %v541_v40 = vpop.xlane.xlu0 %540 }
 0x239   :  { %v570_v43 = vmul.f32 %v1224_v32, %v541_v40 }
 0x23c   :  { %v543_v58 = vpop.xlane.xlu1 %542  ;;  %v545_v36 = vpop.xlane.xlu0 %544 }
 0x23d   :  { %v571_v62 = vmul.f32 %v1233_v38, %v543_v58  ;;  %v572_v30 = vmul.f32 %v1229_v31, %v545_v36 }
 0x23f   :  { %v574_v17 = vadd.f32 %v571_v62, %v570_v43 }
 0x240   :  { %v547_v27 = vpop.xlane.xlu1 %546 }
 0x241   :  { %v575_v50 = vrot.slane %v574_v17, 4  ;;  %v573_v51 = vmul.f32 %v1236_v39, %v547_v27  ;;  %v868_v39 = vpop.eup %867 }
 0x242   :  { %v870_v22 = vpop.eup %869 }
 0x243   :  { %v576_v12 = vadd.f32 %v575_v50, %v574_v17  ;;  %v581_v53 = vadd.f32 %v573_v51, %v572_v30 }
 0x245   :  { %v577_v55 = vrot.slane %v576_v12, 2  ;;  %v582_v32 = vrot.slane %v581_v53, 4 }
 0x247   :  { %v578_v59 = vadd.f32 %v577_v55, %v576_v12  ;;  %v583_v38 = vadd.f32 %v582_v32, %v581_v53 }
 0x249   :  { %v584_v8 = vrot.slane %v583_v38, 2  ;;  %v579_v54 = vrot.slane %v578_v59, 1 }
 0x24b   :  { %v585_v7 = vadd.f32 %v584_v8, %v583_v38  ;;  %v580_v60 = vadd.f32 %v579_v54, %v578_v59 }
 0x24d   :  { %v586_v14 = vrot.slane %v585_v7, 1  ;;  %v589_v61 = vmul.f32 %v864_v2, %v580_v60  ;;  %v596_v31 = vpop.xlane.xlu0 %595  ;;  %v599_v0 = vpop.xlane.xlu1 %598 }
 0x24e   :  { %v601_v42 = vmul.f32 %v866_v15, %v596_v31  ;;  %v603_v28 = vmul.f32 %v870_v22, %v599_v0 }
 0x24f   :  { %v587_v41 = vadd.f32 %v586_v14, %v585_v7  ;;  %v610_v6 = vmul.f32 2.0, %v589_v61 }
 0x250   :  { %v604_v25 = vadd.f32 %v601_v42, %v589_v61 }
 0x251   :  { %v591_v21 = vmul.f32 %v868_v39, %v587_v41  ;;  %v612_v4 = vmul.f32 %v610_v6, %v601_v42 }
 0x252   :  { %v606_v3 = vand.u32 2147483647, %v604_v25 }
 0x253   :  { %v611_v5 = vmul.f32 2.0, %v591_v21  ;;  %v605_v9 = vadd.f32 %v603_v28, %v591_v21 }
 0x254   :  { %vm608_vm12 = vcmp.lt.f32.partialorder %v606_v3, 1e-08 }
 0x255   :  { %v607_v56 = vand.u32 2147483647, %v605_v9  ;;  %v613_v46 = vmul.f32 %v611_v5, %v603_v28  ;;  %v614_v1 = vsel %vm608_vm12, 1.0, %v604_v25 }
 0x256   :  { %871 = vrcp.f32 %v614_v1 }
 0x257   :  { %vm609_vm13 = vcmp.lt.f32.partialorder %v607_v56, 1e-08 }
 0x258   :  { %v615_v10 = vsel %vm609_vm13, 1.0, %v605_v9 }
 0x259   :  { %873 = vrcp.f32 %v615_v10 }
 0x263   :  { %v872_v13 = vpop.eup %871 }
 0x264   :  { %v617_v18 = vmul.f32 %v872_v13, %v612_v4 }
 0x266   :  { %v874_v26 = vpop.eup %873  ;;  %v620_v19 = vsel %vm608_vm12, 0.0, %v617_v18 }
 0x267   :  { %v619_v52 = vmul.f32 %v874_v26, %v613_v46  ;;  %v646_v29 = vadd.f32 -0.8, %v620_v19 }
 0x269   :  { %v621_v20 = vsel %vm609_vm13, 0.0, %v619_v52  ;;  %v624_v23 = vmul.f32 5.0, %v646_v29 }
 0x26a   :  { %v647_v24 = vadd.f32 -0.8, %v621_v20 }
 0x26b   :  { %626 = vst [vmem:[%s1264_s4] sm:$0x1] %v624_v23 }
 0x26c   :  { %v625_v47 = vmul.f32 5.0, %v647_v24 }
 0x26e   :  { %627 = vst [vmem:[%s1264_s4 + $0x1] sm:$0x1] %v625_v47 }

</bundles_post_ra>
